<compile_context>
chip_gen: v7x
topology: tpu7x:2x2x1
jax: 0.10.0
libtpu: 0.0.40
codegen_flags: <defaults>
</compile_context>

<pallas_src>
import functools

import jax
import jax.numpy as jnp
from jax.experimental import pallas as pl
from jax.experimental.pallas import tpu as pltpu


def _round_up(x, m):
    return ((x + m - 1) // m) * m


def _leaky_relu(x, slope):
    return jnp.where(x >= 0, x, slope * x)


def _fused_kernel(x_ref, *rest, nu_p, np_p, num_layers, slope, matmul_dtype):
    """rest = (W0, b0, W1, b1, ..., w_head, b_head, out).

    x_ref: [Ftot, TB] f32 slab ordered [bu; pu; bp; pp] (sub-blocks 8-row padded).
    Weights are block-diagonal fusions of the unary and pair MLPs (see wrapper).
    """
    out_ref = rest[-1]
    p = rest[:-1]

    x = x_ref[...]                                   # [Ftot, TB] f32

    # obj = (beliefs * pots).sum(dim=1); static, sublane-aligned slices of the slab.
    bu = x[0:nu_p]
    pu = x[nu_p:2 * nu_p]
    bp = x[2 * nu_p:2 * nu_p + np_p]
    pp = x[2 * nu_p + np_p:2 * nu_p + 2 * np_p]
    obj = (jnp.sum(bu * pu, axis=0, keepdims=True)
           + jnp.sum(bp * pp, axis=0, keepdims=True))

    # Fused (block-diagonal) unary+pair MLP, weights loaded at point of use.
    xm = x.astype(matmul_dtype)
    h = (jnp.dot(p[0][...], xm, preferred_element_type=jnp.float32) + p[1][...])
    h = _leaky_relu(h, slope)
    for layer in range(1, num_layers - 1):
        w_ref = p[2 * layer]
        b_ref = p[2 * layer + 1]
        h = (jnp.dot(w_ref[...], h.astype(matmul_dtype),
                     preferred_element_type=jnp.float32) + b_ref[...])
        h = _leaky_relu(h, slope)

    # Combined hidden->1 heads: VPU multiply + sublane (XLU) reduce, not an M=1 matmul.
    w_head = p[2 * (num_layers - 1)][...]            # [2H, 1] f32
    b_head = p[2 * (num_layers - 1) + 1][...]        # [1, 1]  f32 (b_last_u + b_last_p)
    obj = obj + jnp.sum(w_head * h, axis=0, keepdims=True) + b_head

    out_ref[...] = obj.astype(out_ref.dtype)         # lane-dense [1, TB] store


def _fuse_params(unary_params, pair_params, Nu, Np, Nu_p, Np_p, matmul_dtype):
    """Fuse the two MLPs' PyTorch-layout (W [out,in], b [out]) params block-diagonally.

    Layer 0 is laid out against the padded slab column order [bu | pu | bp | pp].
    Returns [W0, b0, W1, b1, ..., w_head(2H,1), b_head(1,1)].
    """
    assert len(unary_params) == len(pair_params) >= 2, \
        "MLPTModel sub-models must share depth >= 2"
    Ftot = 2 * Nu_p + 2 * Np_p

    W0u, b0u = unary_params[0]                       # [Hu, 2*Nu], [Hu]
    W0p, b0p = pair_params[0]                        # [Hp, 2*Np], [Hp]
    Hu, Hp = W0u.shape[0], W0p.shape[0]
    W0 = jnp.zeros((Hu + Hp, Ftot), jnp.float32)
    W0 = W0.at[:Hu, 0:Nu].set(W0u[:, :Nu])                                   # @ bu
    W0 = W0.at[:Hu, Nu_p:Nu_p + Nu].set(W0u[:, Nu:])                         # @ pu
    W0 = W0.at[Hu:, 2 * Nu_p:2 * Nu_p + Np].set(W0p[:, :Np])                 # @ bp
    W0 = W0.at[Hu:, 2 * Nu_p + Np_p:2 * Nu_p + Np_p + Np].set(W0p[:, Np:])   # @ pp
    b0 = jnp.concatenate([b0u, b0p]).reshape(-1, 1).astype(jnp.float32)
    flat = [W0.astype(matmul_dtype), b0]

    for (Wu, bu_), (Wp, bp_) in zip(unary_params[1:-1], pair_params[1:-1]):
        ou, iu = Wu.shape
        op_, ip_ = Wp.shape
        Wb = jnp.zeros((ou + op_, iu + ip_), jnp.float32)
        Wb = Wb.at[:ou, :iu].set(Wu)
        Wb = Wb.at[ou:, iu:].set(Wp)
        bb = jnp.concatenate([bu_, bp_]).reshape(-1, 1).astype(jnp.float32)
        flat.append(Wb.astype(matmul_dtype))
        flat.append(bb)

    Wlu, blu = unary_params[-1]                      # [1, Hu], [1]
    Wlp, blp = pair_params[-1]                       # [1, Hp], [1]
    w_head = jnp.concatenate([Wlu.reshape(-1), Wlp.reshape(-1)]
                             ).reshape(-1, 1).astype(jnp.float32)
    b_head = (jnp.sum(blu) + jnp.sum(blp)).reshape(1, 1).astype(jnp.float32)
    flat.append(w_head)
    flat.append(b_head)
    return flat


def input_split_t_forward(beliefs, pots, inputs, unary_params, pair_params,
                          num_unary_pots, *, negative_slope=0.25,
                          matmul_dtype=jnp.bfloat16, max_tile_b=1024):
    """Fused InputSplitTModelV1 forward with MLPTModel sub-models.

    Args:
      beliefs, pots: [B, F] float32, F = num_unary_pots + num_pair_pots.
      inputs: unused by MLPTModel sub-models (accepted for API fidelity).
      unary_params / pair_params: lists of (W [out,in], b [out]) PyTorch-layout Linear
        params; first-layer in-dims are 2*num_unary_pots and 2*num_pair_pots.
      matmul_dtype: dtype for MXU operands (bf16 default; pass jnp.float32 for exact).
    Returns: [B] float32.
    """
    del inputs  # MLPTModel ignores `inputs`.
    B, F = beliefs.shape
    Nu = int(num_unary_pots)
    Np = F - Nu
    assert Nu > 0 and Np > 0, "use_unary/use_pair=False variants not implemented"

    # Sub-block padding (sublane alignment for in-kernel slices / block-diag columns).
    Nu_p = _round_up(Nu, 8)
    Np_p = _round_up(Np, 8)
    Ftot = 2 * Nu_p + 2 * Np_p

    # Batch tile on the lane axis: multiple of 128, clamped by a VMEM budget for the
    # double-buffered data slab, and split so a "parallel" grid feeds both v7x cores.
    B128 = _round_up(B, 128)
    tb_vmem_cap = max(128, (((16 << 20) // (2 * 4 * Ftot)) // 128) * 128)
    TB = min(max_tile_b, B128, tb_vmem_cap)
    if B128 >= 256:
        TB = min(TB, _round_up(-(-B128 // 2), 128))   # guarantee >= 2 grid steps
    TB = max(TB, 128)
    Bp = _round_up(B, TB)

    # One stacked, padded, transposed slab [Ftot, Bp] ordered [bu; pu; bp; pp].
    # (Pure layout plumbing; fuses into the producer under jit.)
    zu = jnp.zeros((B, Nu_p - Nu), beliefs.dtype)
    zp = jnp.zeros((B, Np_p - Np), beliefs.dtype)
    slab = jnp.concatenate(
        [beliefs[:, :Nu], zu, pots[:, :Nu], zu,
         beliefs[:, Nu:], zp, pots[:, Nu:], zp], axis=1)
    slab = jnp.pad(slab, ((0, Bp - B), (0, 0))).T.astype(jnp.float32)   # [Ftot, Bp]

    flat_params = _fuse_params(unary_params, pair_params, Nu, Np, Nu_p, Np_p,
                               matmul_dtype)
    num_layers = len(unary_params)

    data_spec = pl.BlockSpec((Ftot, TB), lambda i: (0, i))
    # Weights / biases: full-array blocks, constant index map -> resident in VMEM.
    # TODO(synk): pipeline_mode=pl.Buffered(1) would halve resident-weight VMEM for
    #             large hidden sizes; omitted to keep lowering maximally portable.
    param_specs = [pl.BlockSpec(p.shape, lambda i: (0, 0)) for p in flat_params]

    kernel = functools.partial(
        _fused_kernel, nu_p=Nu_p, np_p=Np_p, num_layers=num_layers,
        slope=negative_slope, matmul_dtype=matmul_dtype)

    param_bytes = sum(int(p.size) * p.dtype.itemsize for p in flat_params)
    data_buf_bytes = Ftot * TB * 4
    needed = 2 * data_buf_bytes + 2 * TB * 4 + 2 * param_bytes + (2 << 20)
    # >= v6e/v7x scoped default (covers v5e's 16 MiB default), <= v7x physical 64 MiB.
    vmem_limit = int(min(max(needed, 32 << 20), 64 << 20))

    cost = pl.CostEstimate(
        flops=int(2 * Bp * sum(int(p.size) for p in flat_params) + 2 * Bp * Ftot),
        transcendentals=0,
        bytes_accessed=int(4 * Bp * Ftot + 4 * Bp + param_bytes),
    )

    out = pl.pallas_call(
        kernel,
        out_shape=jax.ShapeDtypeStruct((1, Bp), jnp.float32),
        grid=(Bp // TB,),
        in_specs=[data_spec] + param_specs,
        out_specs=pl.BlockSpec((1, TB), lambda i: (0, i)),
        compiler_params=pltpu.CompilerParams(
            dimension_semantics=("parallel",),
            vmem_limit_bytes=vmem_limit),
        cost_estimate=cost,
    )(slab, *flat_params)

    return out[0, :B]


# ----------------------------------------------------------------------------- helpers


def init_mlp_params(key, in_dim, hidden_size, num_layers):
    """PyTorch-Linear-style init: U(-1/sqrt(fan_in), 1/sqrt(fan_in)); W stored [out, in]."""
    dims = [in_dim] + [hidden_size] * (num_layers - 1) + [1]
    params = []
    for i in range(num_layers):
        fan_in, fan_out = dims[i], dims[i + 1]
        key, kw, kb = jax.random.split(key, 3)
        bound = 1.0 / (fan_in ** 0.5)
        W = jax.random.uniform(kw, (fan_out, fan_in), jnp.float32, -bound, bound)
        b = jax.random.uniform(kb, (fan_out,), jnp.float32, -bound, bound)
        params.append((W, b))
    return key, params


def _mlp_ref(x, params, slope=0.25):
    h = x
    for i, (W, b) in enumerate(params):
        h = jnp.dot(h, W.T) + b
        if i < len(params) - 1:
            h = jnp.where(h >= 0, h, slope * h)
    return h[:, 0]


def _ref_forward(beliefs, pots, unary_params, pair_params, Nu, slope=0.25):
    obj = jnp.sum(beliefs * pots, axis=1)
    xu = jnp.concatenate([beliefs[:, :Nu], pots[:, :Nu]], axis=1)
    obj = obj + _mlp_ref(xu, unary_params, slope)
    xp = jnp.concatenate([beliefs[:, Nu:], pots[:, Nu:]], axis=1)
    obj = obj + _mlp_ref(xp, pair_params, slope)
    return obj


if __name__ == "__main__":
    # Small shapes consistent with the module:
    #   num_nodes=5, num_vals=2 -> num_unary_pots = 10
    #   4 pairs                 -> num_pair_pots  = 2*2*4 = 16
    #   t_hidden_size=32, t_num_layers=3, no_t_pots=False (default)
    batch = 8
    num_nodes, num_vals, num_pairs = 5, 2, 4
    hidden_size, num_layers = 32, 3
    Nu = num_nodes * num_vals               # 10
    Np = num_vals * num_vals * num_pairs    # 16
    F = Nu + Np                             # 26

    key = jax.random.PRNGKey(0)
    key, kb, kp, ki = jax.random.split(key, 4)
    beliefs = jax.random.uniform(kb, (batch, F), jnp.float32)
    pots = jax.random.normal(kp, (batch, F), jnp.float32)
    inputs = jax.random.normal(ki, (batch, 4), jnp.float32)  # unused by MLPTModel

    key, unary_params = init_mlp_params(key, 2 * Nu, hidden_size, num_layers)
    key, pair_params = init_mlp_params(key, 2 * Np, hidden_size, num_layers)

    ref = _ref_forward(beliefs, pots, unary_params, pair_params, Nu)

    # Exact (f32 MXU) path: strict tolerance.
    fwd_f32 = jax.jit(functools.partial(
        input_split_t_forward, num_unary_pots=Nu, matmul_dtype=jnp.float32))
    out_f32 = jax.block_until_ready(
        fwd_f32(beliefs, pots, inputs, unary_params, pair_params))
    assert out_f32.shape == (batch,), out_f32.shape
    assert jnp.allclose(out_f32, ref, atol=1e-4, rtol=1e-4), (out_f32, ref)

    # Performance (bf16 MXU-operand) path: looser tolerance due to bf16 rounding.
    fwd_bf16 = jax.jit(functools.partial(
        input_split_t_forward, num_unary_pots=Nu, matmul_dtype=jnp.bfloat16))
    out_bf16 = jax.block_until_ready(
        fwd_bf16(beliefs, pots, inputs, unary_params, pair_params))
    assert out_bf16.shape == (batch,), out_bf16.shape
    assert jnp.allclose(out_bf16, ref, atol=5e-2, rtol=5e-2), (out_bf16, ref)

    print("KERNEL_OK")
</pallas_src>

<mosaic_0001>
module attributes {stable_mosaic.version = 11 : i64} {
  func.func @_fused_kernel(%arg0: i32, %arg1: memref<64x128xf32, #tpu.memory_space<vmem>>, %arg2: memref<64x64xf32, #tpu.memory_space<vmem>>, %arg3: memref<64x1xf32, #tpu.memory_space<vmem>>, %arg4: memref<64x64xf32, #tpu.memory_space<vmem>>, %arg5: memref<64x1xf32, #tpu.memory_space<vmem>>, %arg6: memref<64x1xf32, #tpu.memory_space<vmem>>, %arg7: memref<1x1xf32, #tpu.memory_space<vmem>>, %arg8: memref<1x128xf32, #tpu.memory_space<vmem>>) attributes {dimension_semantics = [#tpu.dimension_semantics<parallel>], iteration_bounds = array<i64: 1>, scalar_prefetch = 0 : i64, scratch_operands = 0 : i64, tpu.core_type = #tpu.core_type<tc>, window_params = [{transform_indices = @transform_0, window_bounds = array<i64: 64, 128>}, {pipeline_mode = #tpu.pipeline_mode<synchronous>, transform_indices = @transform_1, window_bounds = array<i64: 64, 64>}, {pipeline_mode = #tpu.pipeline_mode<synchronous>, transform_indices = @transform_2, window_bounds = array<i64: 64, 1>}, {pipeline_mode = #tpu.pipeline_mode<synchronous>, transform_indices = @transform_3, window_bounds = array<i64: 64, 64>}, {pipeline_mode = #tpu.pipeline_mode<synchronous>, transform_indices = @transform_4, window_bounds = array<i64: 64, 1>}, {pipeline_mode = #tpu.pipeline_mode<synchronous>, transform_indices = @transform_5, window_bounds = array<i64: 64, 1>}, {pipeline_mode = #tpu.pipeline_mode<synchronous>, transform_indices = @transform_6, window_bounds = array<i64: 1, 1>}, {transform_indices = @transform_7, window_bounds = array<i64: 1, 128>}]} {
    %c0 = arith.constant 0 : index
    %c0_0 = arith.constant 0 : index
    %0 = vector.load %arg1[%c0, %c0_0] : memref<64x128xf32, #tpu.memory_space<vmem>>, vector<64x128xf32>
    %1 = vector.extract_strided_slice %0 {offsets = [0, 0], sizes = [16, 128], strides = [1, 1]} : vector<64x128xf32> to vector<16x128xf32>
    %2 = vector.extract_strided_slice %0 {offsets = [16, 0], sizes = [16, 128], strides = [1, 1]} : vector<64x128xf32> to vector<16x128xf32>
    %3 = vector.extract_strided_slice %0 {offsets = [32, 0], sizes = [16, 128], strides = [1, 1]} : vector<64x128xf32> to vector<16x128xf32>
    %4 = vector.extract_strided_slice %0 {offsets = [48, 0], sizes = [16, 128], strides = [1, 1]} : vector<64x128xf32> to vector<16x128xf32>
    %5 = arith.mulf %1, %2 : vector<16x128xf32>
    %cst = arith.constant dense<0.000000e+00> : vector<128xf32>
    %6 = vector.multi_reduction <add>, %5, %cst [0] : vector<16x128xf32> to vector<128xf32>
    %7 = vector.shape_cast %6 : vector<128xf32> to vector<1x128xf32>
    %8 = arith.mulf %3, %4 : vector<16x128xf32>
    %cst_1 = arith.constant dense<0.000000e+00> : vector<128xf32>
    %9 = vector.multi_reduction <add>, %8, %cst_1 [0] : vector<16x128xf32> to vector<128xf32>
    %10 = vector.shape_cast %9 : vector<128xf32> to vector<1x128xf32>
    %11 = arith.addf %7, %10 : vector<1x128xf32>
    %c0_2 = arith.constant 0 : index
    %c0_3 = arith.constant 0 : index
    %12 = vector.load %arg2[%c0_2, %c0_3] : memref<64x64xf32, #tpu.memory_space<vmem>>, vector<64x64xf32>
    %cst_4 = arith.constant dense<0.000000e+00> : vector<64x128xf32>
    %13 = tpu.matmul %12, %0, %cst_4 {dimension_numbers = #tpu.dot_dimension_numbers<[1], [0], [0], [1], [0, 0, 1, 1], [], []>} : vector<64x64xf32>, vector<64x128xf32>, vector<64x128xf32> -> vector<64x128xf32>
    %c0_5 = arith.constant 0 : index
    %c0_6 = arith.constant 0 : index
    %14 = vector.load %arg3[%c0_5, %c0_6] : memref<64x1xf32, #tpu.memory_space<vmem>>, vector<64x1xf32>
    %15 = vector.broadcast %14 : vector<64x1xf32> to vector<64x128xf32>
    %16 = arith.addf %13, %15 : vector<64x128xf32>
    %cst_7 = arith.constant 0.000000e+00 : f32
    %17 = vector.broadcast %cst_7 : f32 to vector<64x128xf32>
    %18 = arith.cmpf oge, %16, %17 : vector<64x128xf32>
    %cst_8 = arith.constant 2.500000e-01 : f32
    %19 = vector.broadcast %cst_8 : f32 to vector<64x128xf32>
    %20 = arith.mulf %19, %16 : vector<64x128xf32>
    %21 = arith.select %18, %16, %20 : vector<64x128xi1>, vector<64x128xf32>
    %c0_9 = arith.constant 0 : index
    %c0_10 = arith.constant 0 : index
    %22 = vector.load %arg4[%c0_9, %c0_10] : memref<64x64xf32, #tpu.memory_space<vmem>>, vector<64x64xf32>
    %cst_11 = arith.constant dense<0.000000e+00> : vector<64x128xf32>
    %23 = tpu.matmul %22, %21, %cst_11 {dimension_numbers = #tpu.dot_dimension_numbers<[1], [0], [0], [1], [0, 0, 1, 1], [], []>} : vector<64x64xf32>, vector<64x128xf32>, vector<64x128xf32> -> vector<64x128xf32>
    %c0_12 = arith.constant 0 : index
    %c0_13 = arith.constant 0 : index
    %24 = vector.load %arg5[%c0_12, %c0_13] : memref<64x1xf32, #tpu.memory_space<vmem>>, vector<64x1xf32>
    %25 = vector.broadcast %24 : vector<64x1xf32> to vector<64x128xf32>
    %26 = arith.addf %23, %25 : vector<64x128xf32>
    %cst_14 = arith.constant 0.000000e+00 : f32
    %27 = vector.broadcast %cst_14 : f32 to vector<64x128xf32>
    %28 = arith.cmpf oge, %26, %27 : vector<64x128xf32>
    %cst_15 = arith.constant 2.500000e-01 : f32
    %29 = vector.broadcast %cst_15 : f32 to vector<64x128xf32>
    %30 = arith.mulf %29, %26 : vector<64x128xf32>
    %31 = arith.select %28, %26, %30 : vector<64x128xi1>, vector<64x128xf32>
    %c0_16 = arith.constant 0 : index
    %c0_17 = arith.constant 0 : index
    %32 = vector.load %arg6[%c0_16, %c0_17] : memref<64x1xf32, #tpu.memory_space<vmem>>, vector<64x1xf32>
    %c0_18 = arith.constant 0 : index
    %c0_19 = arith.constant 0 : index
    %33 = vector.load %arg7[%c0_18, %c0_19] : memref<1x1xf32, #tpu.memory_space<vmem>>, vector<1x1xf32>
    %34 = vector.broadcast %32 : vector<64x1xf32> to vector<64x128xf32>
    %35 = arith.mulf %34, %31 : vector<64x128xf32>
    %cst_20 = arith.constant dense<0.000000e+00> : vector<128xf32>
    %36 = vector.multi_reduction <add>, %35, %cst_20 [0] : vector<64x128xf32> to vector<128xf32>
    %37 = vector.shape_cast %36 : vector<128xf32> to vector<1x128xf32>
    %38 = arith.addf %11, %37 : vector<1x128xf32>
    %39 = vector.broadcast %33 : vector<1x1xf32> to vector<1x128xf32>
    %40 = arith.addf %38, %39 : vector<1x128xf32>
    %c0_21 = arith.constant 0 : index
    %c0_22 = arith.constant 0 : index
    %41 = vector.load %arg8[%c0_21, %c0_22] : memref<1x128xf32, #tpu.memory_space<vmem>>, vector<1x128xf32>
    tpu.vector_store %arg8[%c0_21, %c0_22], %40 {strides = array<i32>} : memref<1x128xf32, #tpu.memory_space<vmem>>, vector<1x128xf32>,
    return
  }
  func.func @transform_0(%arg0: i32) -> (i32, i32) {
    %c0_i32 = arith.constant 0 : i32
    %c0_i32_0 = arith.constant 0 : i32
    return %c0_i32, %arg0 : i32, i32
  }
  func.func @transform_1(%arg0: i32) -> (i32, i32) {
    %c0_i32 = arith.constant 0 : i32
    %c0_i32_0 = arith.constant 0 : i32
    %c0_i32_1 = arith.constant 0 : i32
    return %c0_i32, %c0_i32_0 : i32, i32
  }
  func.func @transform_2(%arg0: i32) -> (i32, i32) {
    %c0_i32 = arith.constant 0 : i32
    %c0_i32_0 = arith.constant 0 : i32
    %c0_i32_1 = arith.constant 0 : i32
    return %c0_i32, %c0_i32_0 : i32, i32
  }
  func.func @transform_3(%arg0: i32) -> (i32, i32) {
    %c0_i32 = arith.constant 0 : i32
    %c0_i32_0 = arith.constant 0 : i32
    %c0_i32_1 = arith.constant 0 : i32
    return %c0_i32, %c0_i32_0 : i32, i32
  }
  func.func @transform_4(%arg0: i32) -> (i32, i32) {
    %c0_i32 = arith.constant 0 : i32
    %c0_i32_0 = arith.constant 0 : i32
    %c0_i32_1 = arith.constant 0 : i32
    return %c0_i32, %c0_i32_0 : i32, i32
  }
  func.func @transform_5(%arg0: i32) -> (i32, i32) {
    %c0_i32 = arith.constant 0 : i32
    %c0_i32_0 = arith.constant 0 : i32
    %c0_i32_1 = arith.constant 0 : i32
    return %c0_i32, %c0_i32_0 : i32, i32
  }
  func.func @transform_6(%arg0: i32) -> (i32, i32) {
    %c0_i32 = arith.constant 0 : i32
    %c0_i32_0 = arith.constant 0 : i32
    %c0_i32_1 = arith.constant 0 : i32
    return %c0_i32, %c0_i32_0 : i32, i32
  }
  func.func @transform_7(%arg0: i32) -> (i32, i32) {
    %c0_i32 = arith.constant 0 : i32
    %c0_i32_0 = arith.constant 0 : i32
    return %c0_i32, %arg0 : i32, i32
  }
}

</mosaic_0001>

<bundles_post_ra>
// kernel: input_split_t_forward.1
= control target key start
LH: loop header
LB: loop body
LE: loop exit
PB: predicated region body
PF: predicated region fallthrough
CT: control target
= control target key end

     0   :  { %vm111_vm0 = vcmask 523264   ;;  %v699_v3 = vmov 0   ;;  %s909_s0 = inlined_call_operand.vmem [shape: f32[64,128], index: 0, kind: input, shape index: {}]   ;;  %s910_s1 = inlined_call_operand.vmem [shape: f32[64,64], index: 1, kind: input, shape index: {}]   ;;  %s911_s6 = inlined_call_operand.<no memory space> [shape: f32[1,1], index: 6, kind: input, shape index: {}]   ;;  %s912_s2 = inlined_call_operand.vmem [shape: f32[64,1], index: 2, kind: input, shape index: {}]   ;;  %s913_s4 = inlined_call_operand.vmem [shape: f32[64,1], index: 4, kind: input, shape index: {}]   ;;  %s914_s5 = inlined_call_operand.vmem [shape: f32[64,1], index: 5, kind: input, shape index: {}]   ;;  %s915_s3 = inlined_call_operand.vmem [shape: f32[64,64], index: 3, kind: input, shape index: {}]   ;;  %s916_s7 = inlined_call_operand.vmem [shape: f32[1,128], index: 7, kind: output, shape index: {}]  }
   0x1   :  { %v28_v0 = vld [vmem:[%s909_s0] sm:$0xff]  ;;  %v29_v1 = vld [vmem:[%s909_s0 + $0x8] sm:$0xff]  ;;  %v30_v2 = vld [vmem:[%s909_s0 + $0x10] sm:$0xff]  ;;  %697 = vset.pattern.permute.xlu0 %v699_v3  ;;  %698 = vset.pattern.permute.xlu1 %v699_v3  ;;  %v12_v4 = vstv %s911_s6 }
   0x2   :  { %v31_v5 = vld [vmem:[%s909_s0 + $0x18] sm:$0xff]  ;;  %v36_v6 = vmul.f32 %v30_v2, %v28_v0  ;;  %v664_v7 = vpack.c.bf16 %v29_v1, %v28_v0  ;;  %v32_v8 = vld [vmem:[%s909_s0 + $0x20] sm:$0xff]  ;;  %v33_v9 = vld [vmem:[%s909_s0 + $0x28] sm:$0xff]  ;;  %13 = vst [vmem:[#allocation2] sm:$0x1] %v12_v4 }
   0x3   :  { %v37_v10 = vmul.f32 %v31_v5, %v29_v1  ;;  %v668_v11 = vpack.c.bf16 %v31_v5, %v30_v2  ;;  %v34_v12 = vld [vmem:[%s909_s0 + $0x30] sm:$0xff]  ;;  %v35_v13 = vld [vmem:[%s909_s0 + $0x38] sm:$0xff]  ;;  %v55_v14 = vld [vmem:[%s910_s1] sm:$0xff]  ;;  %v672_v18 = vpack.c.bf16 %v33_v9, %v32_v8 }
   0x4   :  { %665 = vmatprep.subr.bf16.mxu0 %v664_v7  ;;  %v45_v15 = vmul.f32 %v34_v12, %v32_v8  ;;  %v46_v16 = vmul.f32 %v35_v13, %v33_v9  ;;  %624 = vmatprep.mubr.msk.f32.mxu0 %vm111_vm0, %v55_v14  ;;  %v63_v20 = vld [vmem:[%s912_s2] sm:$0xff]  ;;  %v65_v22 = vld [vmem:[%s912_s2 + $0x10] sm:$0xff]  ;;  %v64_v24 = vld [vmem:[%s912_s2 + $0x8] sm:$0xff]  ;;  %v676_v28 = vpack.c.bf16 %v35_v13, %v34_v12 }
   0x5   :  { %v38_v17 = vadd.f32 %v37_v10, %v36_v6  ;;  %667 = vmatpush3.bf16.msra.mxu0 %v664_v7  ;;  %73 = vperm.xlu0 %697, %v63_v20   ;;  %v66_v26 = vld [vmem:[%s912_s2 + $0x18] sm:$0xff]  ;;  %v67_v31 = vld [vmem:[%s912_s2 + $0x20] sm:$0xff]  ;;  %v68_v33 = vld [vmem:[%s912_s2 + $0x28] sm:$0xff] }
   0x6   :  { %669 = vmatprep.subr.bf16.mxu0 %v668_v11  ;;  %v47_v19 = vadd.f32 %v46_v16, %v45_v15  ;;  %83 = vperm.xlu1 %698, %v65_v22   ;;  %v69_v37 = vld [vmem:[%s912_s2 + $0x30] sm:$0xff]  ;;  %v56_v39 = vld [vmem:[%s910_s1 + $0x8] sm:$0xff]  ;;  %v70_v40 = vld [vmem:[%s912_s2 + $0x38] sm:$0xff] }
   0x7   :  { %v39_v21 = vrot.slane %v38_v17, 4  ;;  %v57_v42 = vld [vmem:[%s910_s1 + $0x10] sm:$0xff]  ;;  %v273_v44 = vld [vmem:[%s913_s4] sm:$0xff]  ;;  %v58_v45 = vld [vmem:[%s910_s1 + $0x18] sm:$0xff] }
   0x8   :  { %v48_v23 = vrot.slane %v47_v19, 4  ;;  %v274_v46 = vld [vmem:[%s913_s4 + $0x8] sm:$0xff]  ;;  %v59_v47 = vld [vmem:[%s910_s1 + $0x20] sm:$0xff]  ;;  %v275_v48 = vld [vmem:[%s913_s4 + $0x10] sm:$0xff] }
   0x9   :  { %v40_v25 = vadd.f32 %v39_v21, %v38_v17  ;;  %671 = vmatpush3.bf16.msra.mxu0 %v668_v11  ;;  %78 = vperm.xlu0 %697, %v64_v24   ;;  %v60_v49 = vld [vmem:[%s910_s1 + $0x28] sm:$0xff]  ;;  %v276_v50 = vld [vmem:[%s913_s4 + $0x18] sm:$0xff]  ;;  %v61_v51 = vld [vmem:[%s910_s1 + $0x30] sm:$0xff] }
   0xa   :  { %673 = vmatprep.subr.bf16.mxu0 %v672_v18  ;;  %v49_v27 = vadd.f32 %v48_v23, %v47_v19  ;;  %88 = vperm.xlu1 %698, %v66_v26   ;;  %v474_v52 = vld [vmem:[%s914_s5] sm:$0xff]  ;;  %v62_v53 = vld [vmem:[%s910_s1 + $0x38] sm:$0xff]  ;;  %v475_v54 = vld [vmem:[%s914_s5 + $0x8] sm:$0xff] }
   0xb   :  { %v41_v29 = vrot.slane %v40_v25, 2  ;;  %v277_v55 = vld [vmem:[%s913_s4 + $0x20] sm:$0xff]  ;;  %v476_v56 = vld [vmem:[%s914_s5 + $0x10] sm:$0xff]  ;;  %v278_v57 = vld [vmem:[%s913_s4 + $0x28] sm:$0xff] }
   0xc   :  { %v50_v30 = vrot.slane %v49_v27, 2  ;;  %v477_v58 = vld [vmem:[%s914_s5 + $0x18] sm:$0xff]  ;;  %v279_v59 = vld [vmem:[%s913_s4 + $0x30] sm:$0xff]  ;;  %v478_v60 = vld [vmem:[%s914_s5 + $0x20] sm:$0xff] }
   0xd   :  { %v42_v32 = vadd.f32 %v41_v29, %v40_v25  ;;  %675 = vmatpush3.bf16.msra.mxu0 %v672_v18  ;;  %93 = vperm.xlu0 %697, %v67_v31   ;;  %v280_v61 = vld [vmem:[%s913_s4 + $0x38] sm:$0xff]  ;;  %v479_v62 = vld [vmem:[%s914_s5 + $0x28] sm:$0xff]  ;;  %v480_v63 = vld [vmem:[%s914_s5 + $0x30] sm:$0xff] }
   0xe   :  { %v51_v34 = vadd.f32 %v50_v30, %v49_v27  ;;  %677 = vmatprep.subr.bf16.mxu0 %v676_v28  ;;  %98 = vperm.xlu1 %698, %v68_v33   ;;  %v481_v0 = vld [vmem:[%s914_s5 + $0x38] sm:$0xff]  ;;  %v482_v1 = vld [vmem:[#allocation2] sm:$0x1] }
   0xf   :  { %v43_v35 = vrot.slane %v42_v32, 1  ;;  %v265_v2 = vld [vmem:[%s915_s3] sm:$0xff] }
  0x10   :  { %v52_v36 = vrot.slane %v51_v34, 1  ;;  %652 = vmatprep.mubr.msk.f32.mxu1 %vm111_vm0, %v265_v2 }
  0x11   :  { %v44_v38 = vadd.f32 %v43_v35, %v42_v32  ;;  %679 = vmatpush3.bf16.msra.mxu0 %v676_v28  ;;  %103 = vperm.xlu0 %697, %v69_v37  }
  0x12   :  { %v53_v41 = vadd.f32 %v52_v36, %v51_v34  ;;  %108 = vperm.xlu1 %698, %v70_v40  }
  0x14   :  { %v801_v43 = vadd.f32 %v53_v41, %v44_v38  ;;  %625 = vmatmul.mubr.msk.f32.vlgmr.msra.gmra.mrb[0].mxu0 %vm111_vm0, %v56_v39 }
  0x15   :  { %627 = vmatprep.mubr.msk.f32.mxu0 %vm111_vm0, %v57_v42  ;;  %283 = vperm.xlu0 %697, %v273_v44  }
  0x16   :  { %288 = vperm.xlu1 %698, %v274_v46  }
  0x18   :  { %628 = vmatmul.mubr.msk.f32.gmra.mrb[2].mxu0 %vm111_vm0, %v58_v45 }
  0x19   :  { %630 = vmatprep.mubr.msk.f32.mxu0 %vm111_vm0, %v59_v47  ;;  %293 = vperm.xlu0 %697, %v275_v48   ;;  %v266_v48 = vld [vmem:[%s915_s3 + $0x8] sm:$0xff] }
  0x1a   :  { %298 = vperm.xlu1 %698, %v276_v50   ;;  %v268_v50 = vld [vmem:[%s915_s3 + $0x18] sm:$0xff] }
  0x1c   :  { %631 = vmatmul.mubr.msk.f32.gmra.mrb[4].mxu0 %vm111_vm0, %v60_v49  ;;  %v267_v49 = vld [vmem:[%s915_s3 + $0x10] sm:$0xff] }
  0x1d   :  { %633 = vmatprep.mubr.msk.f32.mxu0 %vm111_vm0, %v61_v51  ;;  %485 = vperm.xlu0 %697, %v474_v52   ;;  %v269_v51 = vld [vmem:[%s915_s3 + $0x20] sm:$0xff]  ;;  %v270_v52 = vld [vmem:[%s915_s3 + $0x28] sm:$0xff] }
  0x1e   :  { %490 = vperm.xlu1 %698, %v475_v54   ;;  %v272_v54 = vld [vmem:[%s915_s3 + $0x38] sm:$0xff] }
  0x20   :  { %634 = vmatmul.mubr.msk.f32.gmra.mrb[6].mxu0 %vm111_vm0, %v62_v53  ;;  %v271_v53 = vld [vmem:[%s915_s3 + $0x30] sm:$0xff] }
  0x21   :  { %303 = vperm.xlu0 %697, %v277_v55  }
  0x22   :  { %495 = vperm.xlu1 %698, %v476_v56  }
  0x25   :  { %308 = vperm.xlu0 %697, %v278_v57  }
  0x26   :  { %500 = vperm.xlu1 %698, %v477_v58  }
  0x29   :  { %313 = vperm.xlu0 %697, %v279_v59  }
  0x2a   :  { %505 = vperm.xlu1 %698, %v478_v60  }
  0x2d   :  { %318 = vperm.xlu0 %697, %v280_v61  }
  0x2e   :  { %510 = vperm.xlu1 %698, %v479_v62  }
  0x31   :  { %515 = vperm.xlu0 %697, %v480_v63  }
  0x32   :  { %520 = vperm.xlu1 %698, %v481_v0  }
  0x35   :  { %547 = vperm.xlu0 %697, %v482_v1  }
  0x84   :  { %v74_v3 = vpop.permute.xlu0 %73 }
  0x85   :  { %v84_v4 = vpop.permute.xlu1 %83 }
  0x88   :  { %v79_v5 = vpop.permute.xlu0 %78 }
  0x89   :  { %v89_v6 = vpop.permute.xlu1 %88 }
  0x8c   :  { %v94_v20 = vpop.permute.xlu0 %93 }
  0x8d   :  { %v99_v17 = vpop.permute.xlu1 %98 }
  0x90   :  { %v104_v35 = vpop.permute.xlu0 %103 }
  0x91   :  { %v109_v32 = vpop.permute.xlu1 %108 }
  0x94   :  { %v284_v55 = vpop.permute.xlu0 %283 }
  0x95   :  { %v289_v56 = vpop.permute.xlu1 %288 }
  0x98   :  { %v294_v57 = vpop.permute.xlu0 %293 }
  0x99   :  { %v299_v58 = vpop.permute.xlu1 %298 }
  0x9c   :  { %v486_v59 = vpop.permute.xlu0 %485 }
  0x9d   :  { %v491_v60 = vpop.permute.xlu1 %490 }
  0xa0   :  { %v304_v61 = vpop.permute.xlu0 %303 }
  0xa1   :  { %v496_v62 = vpop.permute.xlu1 %495 }
  0xa4   :  { %v309_v63 = vpop.permute.xlu0 %308 }
  0xe7   :  { %v626_v7 = vpop.f32.mrb[0].mxu0 }
  0xe8   :  { %v208_v8 = vadd.f32 %v626_v7, %v79_v5  ;;  %v202_v9 = vpop.f32.mrb[1].mxu0 }
  0xe9   :  { %v203_v10 = vadd.f32 %v202_v9, %v74_v3  ;;  %v501_v3 = vpop.permute.xlu1 %500 }
  0xea   :  { %v250_v11 = vmul.f32 0.25, %v208_v8  ;;  %vm242_vm1 = vcmp.ge.f32.partialorder %v208_v8, 0.0 }
  0xeb   :  { %v249_v12 = vmul.f32 0.25, %v203_v10  ;;  %v629_v13 = vpop.f32.mrb[2].mxu0  ;;  %vm241_vm2 = vcmp.ge.f32.partialorder %v203_v10, 0.0 }
  0xec   :  { %v218_v14 = vadd.f32 %v629_v13, %v89_v6  ;;  %v212_v15 = vpop.f32.mrb[3].mxu0  ;;  %v258_v16 = vsel %vm242_vm1, %v208_v8, %v250_v11  ;;  %v314_v11 = vpop.permute.xlu0 %313 }
  0xed   :  { %v213_v18 = vadd.f32 %v212_v15, %v84_v4  ;;  %v257_v19 = vsel %vm241_vm2, %v203_v10, %v249_v12 }
  0xee   :  { %vm244_vm3 = vcmp.ge.f32.partialorder %v218_v14, 0.0  ;;  %v252_v21 = vmul.f32 0.25, %v218_v14  ;;  %v680_v22 = vpack.c.bf16 %v258_v16, %v257_v19 }
  0xef   :  { %vm243_vm4 = vcmp.ge.f32.partialorder %v213_v18, 0.0  ;;  %v251_v23 = vmul.f32 0.25, %v213_v18  ;;  %v632_v24 = vpop.f32.mrb[4].mxu0 }
  0xf0   :  { %v228_v25 = vadd.f32 %v632_v24, %v99_v17  ;;  %v222_v26 = vpop.f32.mrb[5].mxu0  ;;  %681 = vmatprep.subr.bf16.mxu1 %v680_v22  ;;  %v260_v27 = vsel %vm244_vm3, %v218_v14, %v252_v21  ;;  %v506_v17 = vpop.permute.xlu1 %505 }
  0xf1   :  { %v223_v28 = vadd.f32 %v222_v26, %v94_v20  ;;  %683 = vmatpush3.bf16.msra.mxu1 %v680_v22  ;;  %v259_v29 = vsel %vm243_vm4, %v213_v18, %v251_v23 }
  0xf2   :  { %vm246_vm5 = vcmp.ge.f32.partialorder %v228_v25, 0.0  ;;  %v254_v30 = vmul.f32 0.25, %v228_v25  ;;  %v684_v31 = vpack.c.bf16 %v260_v27, %v259_v29 }
  0xf3   :  { %vm245_vm6 = vcmp.ge.f32.partialorder %v223_v28, 0.0  ;;  %v253_v33 = vmul.f32 0.25, %v223_v28  ;;  %v635_v34 = vpop.f32.mrb[6].mxu0 }
  0xf4   :  { %v238_v36 = vadd.f32 %v635_v34, %v109_v32  ;;  %v232_v37 = vpop.f32.mrb[7].mxu0  ;;  %685 = vmatprep.subr.bf16.mxu1 %v684_v31  ;;  %v262_v38 = vsel %vm246_vm5, %v228_v25, %v254_v30 }
  0xf5   :  { %v233_v39 = vadd.f32 %v232_v37, %v104_v35  ;;  %687 = vmatpush3.bf16.msra.mxu1 %v684_v31  ;;  %v261_v40 = vsel %vm245_vm6, %v223_v28, %v253_v33  ;;  %v319_v28 = vpop.permute.xlu0 %318  ;;  %v511_v35 = vpop.permute.xlu1 %510 }
  0xf6   :  { %vm248_vm7 = vcmp.ge.f32.partialorder %v238_v36, 0.0  ;;  %v256_v41 = vmul.f32 0.25, %v238_v36  ;;  %v688_v42 = vpack.c.bf16 %v262_v38, %v261_v40 }
  0xf7   :  { %vm247_vm8 = vcmp.ge.f32.partialorder %v233_v39, 0.0  ;;  %v255_v44 = vmul.f32 0.25, %v233_v39 }
  0xf8   :  { %689 = vmatprep.subr.bf16.mxu1 %v688_v42  ;;  %v264_v45 = vsel %vm248_vm7, %v238_v36, %v256_v41 }
  0xf9   :  { %691 = vmatpush3.bf16.msra.mxu1 %v688_v42  ;;  %v263_v46 = vsel %vm247_vm8, %v233_v39, %v255_v44 }
  0xfa   :  { %v692_v47 = vpack.c.bf16 %v264_v45, %v263_v46  ;;  %v516_v46 = vpop.permute.xlu0 %515 }
  0xfc   :  { %693 = vmatprep.subr.bf16.mxu1 %v692_v47 }
  0xfd   :  { %695 = vmatpush3.bf16.msra.mxu1 %v692_v47 }
 0x100   :  { %653 = vmatmul.mubr.msk.f32.vlgmr.msra.gmra.mrb[0].mxu1 %vm111_vm0, %v266_v48 }
 0x101   :  { %655 = vmatprep.mubr.msk.f32.mxu1 %vm111_vm0, %v267_v49 }
 0x104   :  { %656 = vmatmul.mubr.msk.f32.gmra.mrb[2].mxu1 %vm111_vm0, %v268_v50 }
 0x105   :  { %658 = vmatprep.mubr.msk.f32.mxu1 %vm111_vm0, %v269_v51  ;;  %v521_v51 = vpop.permute.xlu1 %520 }
 0x108   :  { %659 = vmatmul.mubr.msk.f32.gmra.mrb[4].mxu1 %vm111_vm0, %v270_v52 }
 0x109   :  { %661 = vmatprep.mubr.msk.f32.mxu1 %vm111_vm0, %v271_v53 }
 0x10c   :  { %662 = vmatmul.mubr.msk.f32.gmra.mrb[6].mxu1 %vm111_vm0, %v272_v54 }
 0x1d3   :  { %v654_v0 = vpop.f32.mrb[0].mxu1 }
 0x1d4   :  { %v417_v1 = vadd.f32 %v654_v0, %v289_v56  ;;  %v411_v2 = vpop.f32.mrb[1].mxu1 }
 0x1d5   :  { %v412_v4 = vadd.f32 %v411_v2, %v284_v55  ;;  %v550_v55 = vlaneseq }
 0x1d6   :  { %vm451_vm9 = vcmp.ge.f32.partialorder %v417_v1, 0.0  ;;  %v459_v5 = vmul.f32 0.25, %v417_v1 }
 0x1d7   :  { %vm450_vm10 = vcmp.ge.f32.partialorder %v412_v4, 0.0  ;;  %v458_v6 = vmul.f32 0.25, %v412_v4  ;;  %v657_v7 = vpop.f32.mrb[2].mxu1 }
 0x1d8   :  { %v467_v8 = vsel %vm451_vm9, %v417_v1, %v459_v5  ;;  %v427_v9 = vadd.f32 %v657_v7, %v299_v58  ;;  %v421_v10 = vpop.f32.mrb[3].mxu1  ;;  %v551_v58 = vshrl.u32 %v550_v55, 7 }
 0x1d9   :  { %v524_v12 = vmul.f32 %v491_v60, %v467_v8  ;;  %v466_v13 = vsel %vm450_vm10, %v412_v4, %v458_v6  ;;  %v422_v14 = vadd.f32 %v421_v10, %v294_v57 }
 0x1da   :  { %v523_v15 = vmul.f32 %v486_v59, %v466_v13  ;;  %vm453_vm11 = vcmp.ge.f32.partialorder %v427_v9, 0.0  ;;  %v461_v16 = vmul.f32 0.25, %v427_v9 }
 0x1db   :  { %vm452_vm12 = vcmp.ge.f32.partialorder %v422_v14, 0.0  ;;  %v460_v18 = vmul.f32 0.25, %v422_v14  ;;  %v660_v19 = vpop.f32.mrb[4].mxu1 }
 0x1dc   :  { %v531_v20 = vadd.f32 %v524_v12, %v523_v15  ;;  %v437_v21 = vadd.f32 %v660_v19, %v309_v63  ;;  %v431_v22 = vpop.f32.mrb[5].mxu1  ;;  %v469_v23 = vsel %vm453_vm11, %v427_v9, %v461_v16  ;;  %v548_v63 = vpop.permute.xlu0 %547 }
 0x1dd   :  { %v468_v24 = vsel %vm452_vm12, %v422_v14, %v460_v18  ;;  %v432_v25 = vadd.f32 %v431_v22, %v304_v61  ;;  %v526_v31 = vmul.f32 %v501_v3, %v469_v23  ;;  %v552_v61 = vsub.s32 0, %v551_v58 }
 0x1de   :  { %v525_v26 = vmul.f32 %v496_v62, %v468_v24  ;;  %vm455_vm13 = vcmp.ge.f32.partialorder %v437_v21, 0.0  ;;  %v463_v27 = vmul.f32 0.25, %v437_v21 }
 0x1df   :  { %vm454_vm14 = vcmp.ge.f32.partialorder %v432_v25, 0.0  ;;  %v462_v29 = vmul.f32 0.25, %v432_v25  ;;  %v663_v30 = vpop.f32.mrb[6].mxu1  ;;  %v553_v1 = vrot.slane %v548_v63, %v552_v61 }
 0x1e0   :  { %v532_v32 = vadd.f32 %v531_v20, %v525_v26  ;;  %v447_v33 = vadd.f32 %v663_v30, %v319_v28  ;;  %v441_v34 = vpop.f32.mrb[7].mxu1  ;;  %v471_v36 = vsel %vm455_vm13, %v437_v21, %v463_v27 }
 0x1e1   :  { %v470_v37 = vsel %vm454_vm14, %v432_v25, %v462_v29  ;;  %v442_v38 = vadd.f32 %v441_v34, %v314_v11  ;;  %v528_v44 = vmul.f32 %v511_v35, %v471_v36 }
 0x1e2   :  { %v527_v39 = vmul.f32 %v506_v17, %v470_v37  ;;  %v533_v40 = vadd.f32 %v532_v32, %v526_v31  ;;  %vm457_vm15 = vcmp.ge.f32.partialorder %v447_v33, 0.0  ;;  %v465_v41 = vmul.f32 0.25, %v447_v33 }
 0x1e3   :  { %vm456_vm0 = vcmp.ge.f32.partialorder %v442_v38, 0.0  ;;  %v464_v42 = vmul.f32 0.25, %v442_v38 }
 0x1e4   :  { %v534_v45 = vadd.f32 %v533_v40, %v527_v39  ;;  %v473_v47 = vsel %vm457_vm15, %v447_v33, %v465_v41 }
 0x1e5   :  { %v472_v48 = vsel %vm456_vm0, %v442_v38, %v464_v42  ;;  %v530_v52 = vmul.f32 %v521_v51, %v473_v47 }
 0x1e6   :  { %v529_v49 = vmul.f32 %v516_v46, %v472_v48  ;;  %v535_v50 = vadd.f32 %v534_v45, %v528_v44 }
 0x1e8   :  { %v536_v53 = vadd.f32 %v535_v50, %v529_v49 }
 0x1ea   :  { %v537_v54 = vadd.f32 %v536_v53, %v530_v52 }
 0x1ec   :  { %v538_v56 = vrot.slane %v537_v54, 4 }
 0x1ee   :  { %v539_v57 = vadd.f32 %v538_v56, %v537_v54 }
 0x1f0   :  { %v540_v59 = vrot.slane %v539_v57, 2 }
 0x1f2   :  { %v541_v60 = vadd.f32 %v540_v59, %v539_v57 }
 0x1f4   :  { %v542_v62 = vrot.slane %v541_v60, 1 }
 0x1f6   :  { %v543_v0 = vadd.f32 %v542_v62, %v541_v60 }
 0x1f8   :  { %v544_v2 = vadd.f32 %v543_v0, %v801_v43 }
 0x1fa   :  { %v554_v3 = vadd.f32 %v553_v1, %v544_v2 }
 0x1fc   :  { %555 = vst [vmem:[%s916_s7] sm:$0x1] %v554_v3 }

</bundles_post_ra>
